<compile_context>
chip_gen: v7x
topology: tpu7x:2x2x1
jax: 0.10.0
libtpu: 0.0.40
codegen_flags: <defaults>
</compile_context>

<pallas_src>
import functools
import math

import jax
import jax.numpy as jnp
from jax.experimental import pallas as pl
from jax.experimental.pallas import tpu as pltpu


def _round_up(x, m):
    return (x + m - 1) // m * m


def _mha_kernel(q_ref, k_ref, v_ref,
                wq_ref, bq_ref, wk_ref, bk_ref, wv_ref, bv_ref,
                wo_ref, bo_ref,
                out_ref,
                *, nb, seq, num_heads, dk_p, dv_p, approx_recip):
    cd = q_ref.dtype            # MXU compute dtype (f32 or bf16); accumulation is f32.
    H = num_heads
    rows = nb * seq             # all sequences in this row tile (batch folded into M)

    # ---- Projections: one wide MXU matmul per input over ALL rows in the tile. ----
    q = jnp.dot(q_ref[...], wq_ref[...], preferred_element_type=jnp.float32) + bq_ref[...]
    k = jnp.dot(k_ref[...], wk_ref[...], preferred_element_type=jnp.float32) + bk_ref[...]
    v = jnp.dot(v_ref[...], wv_ref[...], preferred_element_type=jnp.float32) + bv_ref[...]
    # (1/sqrt(dim_k) is already folded into wq/bq by the wrapper.)

    # ---- Head split: 32-lane-aligned slices -> (H*nb, S, d_p) with leading batch dim.
    def split_heads(x, dp):
        parts = [x[:, h * dp:(h + 1) * dp] for h in range(H)]       # each (rows, dp)
        return jnp.stack(parts, axis=0).reshape(H * nb, seq, dp).astype(cd)

    qh = split_heads(q, dk_p)
    kh = split_heads(k, dk_p)
    vh = split_heads(v, dv_p)

    # ---- ONE batched QK^T and ONE batched PV across all heads x sequences. ----
    s = jnp.einsum('bqd,bkd->bqk', qh, kh,
                   preferred_element_type=jnp.float32)              # (H*nb, S, S) f32
    m = jnp.max(s, axis=-1, keepdims=True)
    p = jnp.exp(s - m)                                              # f32 softmax numerator
    l = jnp.sum(p, axis=-1, keepdims=True)
    pv = jnp.einsum('bqk,bkd->bqd', p.astype(cd), vh,
                    preferred_element_type=jnp.float32)             # (H*nb, S, dv_p) f32
    pv = pv * pl.reciprocal(l, approx=approx_recip)                 # deferred normalization

    # ---- Merge heads back onto lanes, then one wide output matmul. ----
    pv = pv.reshape(H, rows, dv_p)
    head_cat = jnp.concatenate([pv[h] for h in range(H)], axis=-1).astype(cd)  # (rows, H*dv_p)
    out = jnp.dot(head_cat, wo_ref[...], preferred_element_type=jnp.float32) + bo_ref[...]
    out_ref[...] = out.astype(out_ref.dtype)                        # lane-dense (rows, 128) store


def multi_head_attention(query, key, value, params, num_heads, *,
                         compute_dtype=jnp.bfloat16, approx_recip=None,
                         out_dtype=jnp.float32, seqs_per_block=None):
    """query/key/value: (B, S, dim_in).  params: fused (stacked-head) weights, unpadded.

    compute_dtype feeds the MXU (bf16 recommended on v6e/v7x; prefer f32 on v5e whose
    VPU/EUP lack bf16); accumulation and softmax are always f32.  approx_recip
    (default: True only on the bf16 path) uses the approximate EUP reciprocal for the
    softmax normalizer — a small, intentional accuracy trade-off vs PyTorch.
    """
    B, S, Din = query.shape
    H = num_heads
    dk = params["wq"].shape[-1] // H
    dv = params["wv"].shape[-1] // H

    cd = jnp.dtype(compute_dtype)
    if approx_recip is None:
        approx_recip = (cd == jnp.bfloat16)

    # ---- Lane-dense zero padding (numerically exact). ----
    Dp = _round_up(Din, 128)
    u = 128 // math.gcd(H, 128)          # per-head pad unit so H*d_p is a multiple of 128
    dk_p = _round_up(dk, u)
    dv_p = _round_up(dv, u)

    def pad_heads_w(w, d, d_p):          # (Din, H*d) -> (Dp, H*d_p)
        w = w.reshape(Din, H, d)
        w = jnp.pad(w, ((0, Dp - Din), (0, 0), (0, d_p - d)))
        return w.reshape(Dp, H * d_p)

    def pad_heads_b(b, d, d_p):          # (1, H*d) -> (1, H*d_p)
        b = b.reshape(1, H, d)
        b = jnp.pad(b, ((0, 0), (0, 0), (0, d_p - d)))
        return b.reshape(1, H * d_p)

    scale = 1.0 / math.sqrt(dk)          # fold 1/sqrt(dim_k) into Wq/bq (zero kernel cost)
    wq = pad_heads_w(params["wq"] * scale, dk, dk_p).astype(cd)
    bq = pad_heads_b(params["bq"] * scale, dk, dk_p).astype(jnp.float32)
    wk = pad_heads_w(params["wk"], dk, dk_p).astype(cd)
    bk = pad_heads_b(params["bk"], dk, dk_p).astype(jnp.float32)
    wv = pad_heads_w(params["wv"], dv, dv_p).astype(cd)
    bv = pad_heads_b(params["bv"], dv, dv_p).astype(jnp.float32)
    wo = params["wo"].reshape(H, dv, Din)
    wo = jnp.pad(wo, ((0, 0), (0, dv_p - dv), (0, Dp - Din))).reshape(H * dv_p, Dp).astype(cd)
    bo = jnp.pad(params["bo"], ((0, 0), (0, Dp - Din))).astype(jnp.float32)

    def pad_act(x):                      # (B, S, Din) -> (B*S, Dp) in compute dtype
        x = jnp.pad(x, ((0, 0), (0, 0), (0, Dp - Din)))
        return x.reshape(B * S, Dp).astype(cd)

    qf, kf, vf = pad_act(query), pad_act(key), pad_act(value)

    # ---- Row tiling: each grid step handles `nb` whole sequences (batch folded into M).
    if seqs_per_block is None:
        nb = max(1, min(B, 128 // max(1, S)))   # target ~128 M-rows per step
        while B % nb:
            nb -= 1
    else:
        nb = seqs_per_block
        assert B % nb == 0, "seqs_per_block must divide the batch"
    TR = nb * S
    if TR % 8 and TR != B * S:                  # keep the sublane dim (8,128)-friendly
        nb, TR = B, B * S
    grid = (B // nb,)

    HDk, HDv = H * dk_p, H * dv_p
    kernel = functools.partial(
        _mha_kernel, nb=nb, seq=S, num_heads=H, dk_p=dk_p, dv_p=dv_p,
        approx_recip=bool(approx_recip))

    grid_spec = pltpu.PrefetchScalarGridSpec(
        num_scalar_prefetch=0,
        grid=grid,
        in_specs=[
            pl.BlockSpec((TR, Dp), lambda i: (i, 0)),    # query rows
            pl.BlockSpec((TR, Dp), lambda i: (i, 0)),    # key rows
            pl.BlockSpec((TR, Dp), lambda i: (i, 0)),    # value rows
            pl.BlockSpec((Dp, HDk), lambda i: (0, 0)),   # Wq (heads fused, scale folded)
            pl.BlockSpec((1, HDk), lambda i: (0, 0)),    # bq
            pl.BlockSpec((Dp, HDk), lambda i: (0, 0)),   # Wk
            pl.BlockSpec((1, HDk), lambda i: (0, 0)),    # bk
            pl.BlockSpec((Dp, HDv), lambda i: (0, 0)),   # Wv
            pl.BlockSpec((1, HDv), lambda i: (0, 0)),    # bv
            pl.BlockSpec((HDv, Dp), lambda i: (0, 0)),   # Wo (heads fused)
            pl.BlockSpec((1, Dp), lambda i: (0, 0)),     # bo
        ],
        out_specs=pl.BlockSpec((TR, Dp), lambda i: (i, 0)),
    )

    out = pl.pallas_call(
        kernel,
        out_shape=jax.ShapeDtypeStruct((B * S, Dp), jnp.dtype(out_dtype)),
        grid_spec=grid_spec,
        compiler_params=pltpu.CompilerParams(
            dimension_semantics=("parallel",),
            vmem_limit_bytes=32 * 1024 * 1024),
    )(qf, kf, vf, wq, bq, wk, bk, wv, bv, wo, bo)

    return out[:, :Din].reshape(B, S, Din)


def init_params(key, num_heads, dim_in, dim_k, dim_v):
    """Deterministic synthetic parameters with heads fused along the output dim."""
    ks = jax.random.split(key, 8)
    scale = 0.1
    wq = scale * jax.random.normal(ks[0], (dim_in, num_heads * dim_k), jnp.float32)
    bq = scale * jax.random.normal(ks[1], (1, num_heads * dim_k), jnp.float32)
    wk = scale * jax.random.normal(ks[2], (dim_in, num_heads * dim_k), jnp.float32)
    bk = scale * jax.random.normal(ks[3], (1, num_heads * dim_k), jnp.float32)
    wv = scale * jax.random.normal(ks[4], (dim_in, num_heads * dim_v), jnp.float32)
    bv = scale * jax.random.normal(ks[5], (1, num_heads * dim_v), jnp.float32)
    # PyTorch Linear(H*Dv, Din) weight (Din, H*Dv): store its transpose (H*Dv, Din).
    wo = scale * jax.random.normal(ks[6], (num_heads * dim_v, dim_in), jnp.float32)
    bo = scale * jax.random.normal(ks[7], (1, dim_in), jnp.float32)
    return dict(wq=wq, bq=bq, wk=wk, bk=bk, wv=wv, bv=bv, wo=wo, bo=bo)


def reference_mha(query, key, value, p, num_heads):
    """Pure-JAX reference mirroring the PyTorch module semantics."""
    dim_k = p["wq"].shape[-1] // num_heads
    dim_v = p["wv"].shape[-1] // num_heads
    q = query @ p["wq"] + p["bq"]   # (B, S, H*Dk)
    k = key @ p["wk"] + p["bk"]
    v = value @ p["wv"] + p["bv"]
    outs = []
    for h in range(num_heads):
        qh = q[..., h * dim_k:(h + 1) * dim_k]
        kh = k[..., h * dim_k:(h + 1) * dim_k]
        vh = v[..., h * dim_v:(h + 1) * dim_v]
        s = jnp.einsum("bsd,btd->bst", qh, kh) / (dim_k ** 0.5)
        a = jax.nn.softmax(s, axis=-1)
        outs.append(jnp.einsum("bst,btd->bsd", a, vh))
    cat = jnp.concatenate(outs, axis=-1)          # (B, S, H*Dv)
    return cat @ p["wo"] + p["bo"]


if __name__ == "__main__":
    num_heads, dim_in, dim_k, dim_v = 4, 32, 16, 16
    B, S = 2, 8

    root = jax.random.PRNGKey(0)
    kq, kk, kv, kp = jax.random.split(root, 4)
    query = jax.random.normal(kq, (B, S, dim_in), jnp.float32)
    key = jax.random.normal(kk, (B, S, dim_in), jnp.float32)
    value = jax.random.normal(kv, (B, S, dim_in), jnp.float32)
    params = init_params(kp, num_heads, dim_in, dim_k, dim_v)

    ref = reference_mha(query, key, value, params, num_heads)

    # Full-f32 MXU path (exact reciprocal) — tight check.  (Recommended on v5e.)
    out_f32 = multi_head_attention(query, key, value, params, num_heads,
                                   compute_dtype=jnp.float32)
    out_f32 = jax.block_until_ready(out_f32)
    assert out_f32.shape == (B, S, dim_in)
    assert jnp.allclose(out_f32, ref, atol=1e-3, rtol=1e-3), "f32 mismatch vs reference"

    # bf16-on-MXU path (v6e/v7x recommendation; softmax stays f32) — looser check.
    out_bf16 = multi_head_attention(query, key, value, params, num_heads,
                                    compute_dtype=jnp.bfloat16)
    out_bf16 = jax.block_until_ready(out_bf16)
    assert out_bf16.shape == (B, S, dim_in)
    assert jnp.allclose(out_bf16, ref, atol=5e-2, rtol=5e-2), "bf16 mismatch vs reference"

    print("KERNEL_OK")
</pallas_src>

<mosaic_0001>
module attributes {stable_mosaic.version = 11 : i64} {
  func.func @_mha_kernel(%arg0: i32, %arg1: memref<16x128xf32, #tpu.memory_space<vmem>>, %arg2: memref<16x128xf32, #tpu.memory_space<vmem>>, %arg3: memref<16x128xf32, #tpu.memory_space<vmem>>, %arg4: memref<128x128xf32, #tpu.memory_space<vmem>>, %arg5: memref<1x128xf32, #tpu.memory_space<vmem>>, %arg6: memref<128x128xf32, #tpu.memory_space<vmem>>, %arg7: memref<1x128xf32, #tpu.memory_space<vmem>>, %arg8: memref<128x128xf32, #tpu.memory_space<vmem>>, %arg9: memref<1x128xf32, #tpu.memory_space<vmem>>, %arg10: memref<128x128xf32, #tpu.memory_space<vmem>>, %arg11: memref<1x128xf32, #tpu.memory_space<vmem>>, %arg12: memref<16x128xf32, #tpu.memory_space<vmem>>) attributes {dimension_semantics = [#tpu.dimension_semantics<parallel>], iteration_bounds = array<i64: 1>, scalar_prefetch = 0 : i64, scratch_operands = 0 : i64, tpu.core_type = #tpu.core_type<tc>, window_params = [{transform_indices = @transform_0, window_bounds = array<i64: 16, 128>}, {transform_indices = @transform_1, window_bounds = array<i64: 16, 128>}, {transform_indices = @transform_2, window_bounds = array<i64: 16, 128>}, {pipeline_mode = #tpu.pipeline_mode<synchronous>, transform_indices = @transform_3, window_bounds = array<i64: 128, 128>}, {pipeline_mode = #tpu.pipeline_mode<synchronous>, transform_indices = @transform_4, window_bounds = array<i64: 1, 128>}, {pipeline_mode = #tpu.pipeline_mode<synchronous>, transform_indices = @transform_5, window_bounds = array<i64: 128, 128>}, {pipeline_mode = #tpu.pipeline_mode<synchronous>, transform_indices = @transform_6, window_bounds = array<i64: 1, 128>}, {pipeline_mode = #tpu.pipeline_mode<synchronous>, transform_indices = @transform_7, window_bounds = array<i64: 128, 128>}, {pipeline_mode = #tpu.pipeline_mode<synchronous>, transform_indices = @transform_8, window_bounds = array<i64: 1, 128>}, {pipeline_mode = #tpu.pipeline_mode<synchronous>, transform_indices = @transform_9, window_bounds = array<i64: 128, 128>}, {pipeline_mode = #tpu.pipeline_mode<synchronous>, transform_indices = @transform_10, window_bounds = array<i64: 1, 128>}, {transform_indices = @transform_11, window_bounds = array<i64: 16, 128>}]} {
    %c0 = arith.constant 0 : index
    %c0_0 = arith.constant 0 : index
    %0 = vector.load %arg1[%c0, %c0_0] : memref<16x128xf32, #tpu.memory_space<vmem>>, vector<16x128xf32>
    %c0_1 = arith.constant 0 : index
    %c0_2 = arith.constant 0 : index
    %1 = vector.load %arg4[%c0_1, %c0_2] : memref<128x128xf32, #tpu.memory_space<vmem>>, vector<128x128xf32>
    %cst = arith.constant dense<0.000000e+00> : vector<16x128xf32>
    %2 = tpu.matmul %0, %1, %cst {dimension_numbers = #tpu.dot_dimension_numbers<[1], [0], [0], [1], [0, 0, 1, 1], [], []>} : vector<16x128xf32>, vector<128x128xf32>, vector<16x128xf32> -> vector<16x128xf32>
    %c0_3 = arith.constant 0 : index
    %c0_4 = arith.constant 0 : index
    %3 = vector.load %arg5[%c0_3, %c0_4] : memref<1x128xf32, #tpu.memory_space<vmem>>, vector<1x128xf32>
    %4 = vector.broadcast %3 : vector<1x128xf32> to vector<16x128xf32>
    %5 = arith.addf %2, %4 : vector<16x128xf32>
    %c0_5 = arith.constant 0 : index
    %c0_6 = arith.constant 0 : index
    %6 = vector.load %arg2[%c0_5, %c0_6] : memref<16x128xf32, #tpu.memory_space<vmem>>, vector<16x128xf32>
    %c0_7 = arith.constant 0 : index
    %c0_8 = arith.constant 0 : index
    %7 = vector.load %arg6[%c0_7, %c0_8] : memref<128x128xf32, #tpu.memory_space<vmem>>, vector<128x128xf32>
    %cst_9 = arith.constant dense<0.000000e+00> : vector<16x128xf32>
    %8 = tpu.matmul %6, %7, %cst_9 {dimension_numbers = #tpu.dot_dimension_numbers<[1], [0], [0], [1], [0, 0, 1, 1], [], []>} : vector<16x128xf32>, vector<128x128xf32>, vector<16x128xf32> -> vector<16x128xf32>
    %c0_10 = arith.constant 0 : index
    %c0_11 = arith.constant 0 : index
    %9 = vector.load %arg7[%c0_10, %c0_11] : memref<1x128xf32, #tpu.memory_space<vmem>>, vector<1x128xf32>
    %10 = vector.broadcast %9 : vector<1x128xf32> to vector<16x128xf32>
    %11 = arith.addf %8, %10 : vector<16x128xf32>
    %c0_12 = arith.constant 0 : index
    %c0_13 = arith.constant 0 : index
    %12 = vector.load %arg3[%c0_12, %c0_13] : memref<16x128xf32, #tpu.memory_space<vmem>>, vector<16x128xf32>
    %c0_14 = arith.constant 0 : index
    %c0_15 = arith.constant 0 : index
    %13 = vector.load %arg8[%c0_14, %c0_15] : memref<128x128xf32, #tpu.memory_space<vmem>>, vector<128x128xf32>
    %cst_16 = arith.constant dense<0.000000e+00> : vector<16x128xf32>
    %14 = tpu.matmul %12, %13, %cst_16 {dimension_numbers = #tpu.dot_dimension_numbers<[1], [0], [0], [1], [0, 0, 1, 1], [], []>} : vector<16x128xf32>, vector<128x128xf32>, vector<16x128xf32> -> vector<16x128xf32>
    %c0_17 = arith.constant 0 : index
    %c0_18 = arith.constant 0 : index
    %15 = vector.load %arg9[%c0_17, %c0_18] : memref<1x128xf32, #tpu.memory_space<vmem>>, vector<1x128xf32>
    %16 = vector.broadcast %15 : vector<1x128xf32> to vector<16x128xf32>
    %17 = arith.addf %14, %16 : vector<16x128xf32>
    %18 = vector.extract_strided_slice %5 {offsets = [0, 0], sizes = [16, 32], strides = [1, 1]} : vector<16x128xf32> to vector<16x32xf32>
    %19 = vector.extract_strided_slice %5 {offsets = [0, 32], sizes = [16, 32], strides = [1, 1]} : vector<16x128xf32> to vector<16x32xf32>
    %20 = vector.extract_strided_slice %5 {offsets = [0, 64], sizes = [16, 32], strides = [1, 1]} : vector<16x128xf32> to vector<16x32xf32>
    %21 = vector.extract_strided_slice %5 {offsets = [0, 96], sizes = [16, 32], strides = [1, 1]} : vector<16x128xf32> to vector<16x32xf32>
    %22 = vector.shape_cast %18 : vector<16x32xf32> to vector<1x16x32xf32>
    %23 = vector.shape_cast %19 : vector<16x32xf32> to vector<1x16x32xf32>
    %24 = vector.shape_cast %20 : vector<16x32xf32> to vector<1x16x32xf32>
    %25 = vector.shape_cast %21 : vector<16x32xf32> to vector<1x16x32xf32>
    %26 = tpu.concatenate %22, %23, %24, %25 in 0 : vector<1x16x32xf32>, vector<1x16x32xf32>, vector<1x16x32xf32>, vector<1x16x32xf32> -> vector<4x16x32xf32>
    %27 = vector.shape_cast %26 : vector<4x16x32xf32> to vector<8x8x32xf32>
    %28 = vector.extract_strided_slice %11 {offsets = [0, 0], sizes = [16, 32], strides = [1, 1]} : vector<16x128xf32> to vector<16x32xf32>
    %29 = vector.extract_strided_slice %11 {offsets = [0, 32], sizes = [16, 32], strides = [1, 1]} : vector<16x128xf32> to vector<16x32xf32>
    %30 = vector.extract_strided_slice %11 {offsets = [0, 64], sizes = [16, 32], strides = [1, 1]} : vector<16x128xf32> to vector<16x32xf32>
    %31 = vector.extract_strided_slice %11 {offsets = [0, 96], sizes = [16, 32], strides = [1, 1]} : vector<16x128xf32> to vector<16x32xf32>
    %32 = vector.shape_cast %28 : vector<16x32xf32> to vector<1x16x32xf32>
    %33 = vector.shape_cast %29 : vector<16x32xf32> to vector<1x16x32xf32>
    %34 = vector.shape_cast %30 : vector<16x32xf32> to vector<1x16x32xf32>
    %35 = vector.shape_cast %31 : vector<16x32xf32> to vector<1x16x32xf32>
    %36 = tpu.concatenate %32, %33, %34, %35 in 0 : vector<1x16x32xf32>, vector<1x16x32xf32>, vector<1x16x32xf32>, vector<1x16x32xf32> -> vector<4x16x32xf32>
    %37 = vector.shape_cast %36 : vector<4x16x32xf32> to vector<8x8x32xf32>
    %38 = vector.extract_strided_slice %17 {offsets = [0, 0], sizes = [16, 32], strides = [1, 1]} : vector<16x128xf32> to vector<16x32xf32>
    %39 = vector.extract_strided_slice %17 {offsets = [0, 32], sizes = [16, 32], strides = [1, 1]} : vector<16x128xf32> to vector<16x32xf32>
    %40 = vector.extract_strided_slice %17 {offsets = [0, 64], sizes = [16, 32], strides = [1, 1]} : vector<16x128xf32> to vector<16x32xf32>
    %41 = vector.extract_strided_slice %17 {offsets = [0, 96], sizes = [16, 32], strides = [1, 1]} : vector<16x128xf32> to vector<16x32xf32>
    %42 = vector.shape_cast %38 : vector<16x32xf32> to vector<1x16x32xf32>
    %43 = vector.shape_cast %39 : vector<16x32xf32> to vector<1x16x32xf32>
    %44 = vector.shape_cast %40 : vector<16x32xf32> to vector<1x16x32xf32>
    %45 = vector.shape_cast %41 : vector<16x32xf32> to vector<1x16x32xf32>
    %46 = tpu.concatenate %42, %43, %44, %45 in 0 : vector<1x16x32xf32>, vector<1x16x32xf32>, vector<1x16x32xf32>, vector<1x16x32xf32> -> vector<4x16x32xf32>
    %47 = vector.shape_cast %46 : vector<4x16x32xf32> to vector<8x8x32xf32>
    "tpu.trace_start"() <{level = 10 : i32, message = "bqd,bkd->bqk"}> : () -> ()
    %cst_19 = arith.constant dense<0.000000e+00> : vector<8x8x8xf32>
    %48 = tpu.matmul %27, %37, %cst_19 {dimension_numbers = #tpu.dot_dimension_numbers<[2], [2], [1], [1], [0, 0, 0, 1, 1, 1], [0], [0]>} : vector<8x8x32xf32>, vector<8x8x32xf32>, vector<8x8x8xf32> -> vector<8x8x8xf32>
    "tpu.trace_stop"() : () -> ()
    %cst_20 = arith.constant dense<0xFF800000> : vector<8x8xf32>
    %49 = vector.multi_reduction <maximumf>, %48, %cst_20 [2] : vector<8x8x8xf32> to vector<8x8xf32>
    %50 = vector.shape_cast %49 : vector<8x8xf32> to vector<8x8x1xf32>
    %51 = vector.broadcast %50 : vector<8x8x1xf32> to vector<8x8x8xf32>
    %52 = arith.subf %48, %51 : vector<8x8x8xf32>
    %53 = math.exp %52 : vector<8x8x8xf32>
    %cst_21 = arith.constant dense<0.000000e+00> : vector<8x8xf32>
    %54 = vector.multi_reduction <add>, %53, %cst_21 [2] : vector<8x8x8xf32> to vector<8x8xf32>
    %55 = vector.shape_cast %54 : vector<8x8xf32> to vector<8x8x1xf32>
    "tpu.trace_start"() <{level = 10 : i32, message = "bqk,bkd->bqd"}> : () -> ()
    %cst_22 = arith.constant dense<0.000000e+00> : vector<8x8x32xf32>
    %56 = tpu.matmul %53, %47, %cst_22 {dimension_numbers = #tpu.dot_dimension_numbers<[2], [1], [1], [2], [0, 0, 0, 1, 1, 2], [0], [0]>} : vector<8x8x8xf32>, vector<8x8x32xf32>, vector<8x8x32xf32> -> vector<8x8x32xf32>
    "tpu.trace_stop"() : () -> ()
    %57 = tpu.reciprocal %55 : vector<8x8x1xf32> -> vector<8x8x1xf32>
    %58 = vector.broadcast %57 : vector<8x8x1xf32> to vector<8x8x32xf32>
    %59 = arith.mulf %56, %58 : vector<8x8x32xf32>
    %60 = vector.shape_cast %59 : vector<8x8x32xf32> to vector<4x16x32xf32>
    %61 = vector.extract_strided_slice %60 {offsets = [0, 0, 0], sizes = [1, 16, 32], strides = [1, 1, 1]} : vector<4x16x32xf32> to vector<1x16x32xf32>
    %62 = vector.shape_cast %61 : vector<1x16x32xf32> to vector<16x32xf32>
    %63 = vector.extract_strided_slice %60 {offsets = [1, 0, 0], sizes = [1, 16, 32], strides = [1, 1, 1]} : vector<4x16x32xf32> to vector<1x16x32xf32>
    %64 = vector.shape_cast %63 : vector<1x16x32xf32> to vector<16x32xf32>
    %65 = vector.extract_strided_slice %60 {offsets = [2, 0, 0], sizes = [1, 16, 32], strides = [1, 1, 1]} : vector<4x16x32xf32> to vector<1x16x32xf32>
    %66 = vector.shape_cast %65 : vector<1x16x32xf32> to vector<16x32xf32>
    %67 = vector.extract_strided_slice %60 {offsets = [3, 0, 0], sizes = [1, 16, 32], strides = [1, 1, 1]} : vector<4x16x32xf32> to vector<1x16x32xf32>
    %68 = vector.shape_cast %67 : vector<1x16x32xf32> to vector<16x32xf32>
    %69 = tpu.concatenate %62, %64, %66, %68 in 1 : vector<16x32xf32>, vector<16x32xf32>, vector<16x32xf32>, vector<16x32xf32> -> vector<16x128xf32>
    %c0_23 = arith.constant 0 : index
    %c0_24 = arith.constant 0 : index
    %70 = vector.load %arg10[%c0_23, %c0_24] : memref<128x128xf32, #tpu.memory_space<vmem>>, vector<128x128xf32>
    %cst_25 = arith.constant dense<0.000000e+00> : vector<16x128xf32>
    %71 = tpu.matmul %69, %70, %cst_25 {dimension_numbers = #tpu.dot_dimension_numbers<[1], [0], [0], [1], [0, 0, 1, 1], [], []>} : vector<16x128xf32>, vector<128x128xf32>, vector<16x128xf32> -> vector<16x128xf32>
    %c0_26 = arith.constant 0 : index
    %c0_27 = arith.constant 0 : index
    %72 = vector.load %arg11[%c0_26, %c0_27] : memref<1x128xf32, #tpu.memory_space<vmem>>, vector<1x128xf32>
    %73 = vector.broadcast %72 : vector<1x128xf32> to vector<16x128xf32>
    %74 = arith.addf %71, %73 : vector<16x128xf32>
    %c0_28 = arith.constant 0 : index
    %c0_29 = arith.constant 0 : index
    %75 = vector.load %arg12[%c0_28, %c0_29] : memref<16x128xf32, #tpu.memory_space<vmem>>, vector<16x128xf32>
    tpu.vector_store %arg12[%c0_28, %c0_29], %74 {strides = array<i32>} : memref<16x128xf32, #tpu.memory_space<vmem>>, vector<16x128xf32>,
    return
  }
  func.func @transform_0(%arg0: i32) -> (i32, i32) {
    %c0_i32 = arith.constant 0 : i32
    %c0_i32_0 = arith.constant 0 : i32
    return %arg0, %c0_i32 : i32, i32
  }
  func.func @transform_1(%arg0: i32) -> (i32, i32) {
    %c0_i32 = arith.constant 0 : i32
    %c0_i32_0 = arith.constant 0 : i32
    return %arg0, %c0_i32 : i32, i32
  }
  func.func @transform_2(%arg0: i32) -> (i32, i32) {
    %c0_i32 = arith.constant 0 : i32
    %c0_i32_0 = arith.constant 0 : i32
    return %arg0, %c0_i32 : i32, i32
  }
  func.func @transform_3(%arg0: i32) -> (i32, i32) {
    %c0_i32 = arith.constant 0 : i32
    %c0_i32_0 = arith.constant 0 : i32
    %c0_i32_1 = arith.constant 0 : i32
    return %c0_i32, %c0_i32_0 : i32, i32
  }
  func.func @transform_4(%arg0: i32) -> (i32, i32) {
    %c0_i32 = arith.constant 0 : i32
    %c0_i32_0 = arith.constant 0 : i32
    %c0_i32_1 = arith.constant 0 : i32
    return %c0_i32, %c0_i32_0 : i32, i32
  }
  func.func @transform_5(%arg0: i32) -> (i32, i32) {
    %c0_i32 = arith.constant 0 : i32
    %c0_i32_0 = arith.constant 0 : i32
    %c0_i32_1 = arith.constant 0 : i32
    return %c0_i32, %c0_i32_0 : i32, i32
  }
  func.func @transform_6(%arg0: i32) -> (i32, i32) {
    %c0_i32 = arith.constant 0 : i32
    %c0_i32_0 = arith.constant 0 : i32
    %c0_i32_1 = arith.constant 0 : i32
    return %c0_i32, %c0_i32_0 : i32, i32
  }
  func.func @transform_7(%arg0: i32) -> (i32, i32) {
    %c0_i32 = arith.constant 0 : i32
    %c0_i32_0 = arith.constant 0 : i32
    %c0_i32_1 = arith.constant 0 : i32
    return %c0_i32, %c0_i32_0 : i32, i32
  }
  func.func @transform_8(%arg0: i32) -> (i32, i32) {
    %c0_i32 = arith.constant 0 : i32
    %c0_i32_0 = arith.constant 0 : i32
    %c0_i32_1 = arith.constant 0 : i32
    return %c0_i32, %c0_i32_0 : i32, i32
  }
  func.func @transform_9(%arg0: i32) -> (i32, i32) {
    %c0_i32 = arith.constant 0 : i32
    %c0_i32_0 = arith.constant 0 : i32
    %c0_i32_1 = arith.constant 0 : i32
    return %c0_i32, %c0_i32_0 : i32, i32
  }
  func.func @transform_10(%arg0: i32) -> (i32, i32) {
    %c0_i32 = arith.constant 0 : i32
    %c0_i32_0 = arith.constant 0 : i32
    %c0_i32_1 = arith.constant 0 : i32
    return %c0_i32, %c0_i32_0 : i32, i32
  }
  func.func @transform_11(%arg0: i32) -> (i32, i32) {
    %c0_i32 = arith.constant 0 : i32
    %c0_i32_0 = arith.constant 0 : i32
    return %arg0, %c0_i32 : i32, i32
  }
}

</mosaic_0001>

<bundles_post_ra>
// kernel: tpu_custom_call.1
= control target key start
LH: loop header
LB: loop body
LE: loop exit
PB: predicated region body
PF: predicated region fallthrough
CT: control target
= control target key end

     0   :  { %16 = vsyncpa [#allocation3], 0  ;;  %s2997_s0 = inlined_call_operand.hbm [shape: f32[16,128], index: 0, kind: input, shape index: {}]   ;;  %s2998_s1 = inlined_call_operand.hbm [shape: f32[16,128], index: 1, kind: input, shape index: {}]   ;;  %s2999_s2 = inlined_call_operand.hbm [shape: f32[16,128], index: 2, kind: input, shape index: {}]   ;;  %s3000_s3 = inlined_call_operand.hbm [shape: f32[128,128], index: 3, kind: input, shape index: {}]   ;;  %s3001_s4 = inlined_call_operand.vmem [shape: f32[1,128], index: 4, kind: input, shape index: {}]   ;;  %s3002_s5 = inlined_call_operand.hbm [shape: f32[128,128], index: 5, kind: input, shape index: {}]   ;;  %s3003_s6 = inlined_call_operand.vmem [shape: f32[1,128], index: 6, kind: input, shape index: {}]   ;;  %s3004_s7 = inlined_call_operand.hbm [shape: f32[128,128], index: 7, kind: input, shape index: {}]   ;;  %s3005_s8 = inlined_call_operand.vmem [shape: f32[1,128], index: 8, kind: input, shape index: {}]   ;;  %s3006_s9 = inlined_call_operand.hbm [shape: f32[128,128], index: 9, kind: input, shape index: {}]   ;;  %s3007_s10 = inlined_call_operand.vmem [shape: f32[1,128], index: 10, kind: input, shape index: {}]   ;;  %s3008_s11 = inlined_call_operand.hbm [shape: f32[16,128], index: 11, kind: output, shape index: {}]  }
   0x1   :  { %17 = vsyncpa [#allocation6], 0 }
   0x2   :  { %18 = vsyncpa [#allocation9], 0 }
   0x3   :  { %19 = vsyncpa [#allocation12], 0 }
   0x4   :  { %20 = vsyncpa [#allocation4], 0  ;;  %s2628_s17 = smov [#allocation5]   ;;  %s2629_s19 = smov [#allocation8]  }
   0x5   :  { %s38_s18 = sshll.u32 %s2628_s17, 4  ;;  %s62_s20 = sshll.u32 %s2629_s19, 4  ;;  %s39_s18 = int_to_ptr.vmem [resolvable:$true] %s38_s18  ;;  %s2703_s20 = int_to_ptr.vmem [resolvable:$true] %s62_s20 }
   0x6   :  { %s2442_s23 = scalar_lea.hbm %s2998_s1, 256 }
   0x7   :  { %p2443_p0 = scmp.ne.s32.totalorder %s2998_s1, %s2442_s23  ;;  %p2446_p1 = scmp.lt.u32.totalorder %s2442_s23, %s2998_s1 }
   0x9   :  { %p2448_p2 = pnand %p2446_p1, %p2443_p0 }
   0xb   :  { %2451 = shalt.err (!%p2448_p2)
}
   0xc   :  { %s2452_s28 = scalar_lea.vmem %s39_s18, 256  ;;  %p2457_p4 = scmp.lt.s32.totalorder %s39_s18, %s39_s18 }
   0xd   :  { %p2453_p3 = scmp.ne.s32.totalorder %s39_s18, %s2452_s28  ;;  %p2458_p5 = scmp.lt.s32.totalorder %s2452_s28, %s2452_s28 }
   0xf   :  { %p2459_p6 = por %p2458_p5, %p2457_p4 }
  0x11   :  { %p2460_p7 = pnand %p2459_p6, %p2453_p3 }
  0x13   :  { %2463 = shalt.err (!%p2460_p7)
}
  0x14   :  { %s2630_s29 = smov 128   ;;  %s2631_s30 = smov 8  }
  0x15   :  { %44 = dma.hbm_to_vmem [thread:$0]  %s2998_s1, 256, %s39_s18, [#allocation6], %s2630_s29, %s2630_s29, %s2631_s30  }
  0x16   :  { %s2464_s16 = scalar_lea.hbm %s3000_s3, 2048 }
  0x17   :  { %p2465_p8 = scmp.ne.s32.totalorder %s3000_s3, %s2464_s16  ;;  %p2468_p9 = scmp.lt.u32.totalorder %s2464_s16, %s3000_s3 }
  0x19   :  { %p2470_p10 = pnand %p2468_p9, %p2465_p8 }
  0x1b   :  { %2473 = shalt.err (!%p2470_p10)
}
  0x1c   :  { %s2474_s23 = scalar_lea.vmem %s2703_s20, 2048  ;;  %p2479_p12 = scmp.lt.s32.totalorder %s2703_s20, %s2703_s20 }
  0x1d   :  { %p2475_p11 = scmp.ne.s32.totalorder %s2703_s20, %s2474_s23  ;;  %p2480_p13 = scmp.lt.s32.totalorder %s2474_s23, %s2474_s23 }
  0x1f   :  { %p2481_p0 = por %p2480_p13, %p2479_p12 }
  0x21   :  { %p2482_p1 = pnand %p2481_p0, %p2475_p11 }
  0x23   :  { %2485 = shalt.err (!%p2482_p1)
}
  0x24   :  { %68 = dma.hbm_to_vmem [thread:$0]  %s3000_s3, 2048, %s2703_s20, [#allocation9], %s2630_s29, %s2630_s29, %s2631_s30  }
  0x25   :  { %s2632_s24 = smov [#allocation11]   ;;  %s2633_s26 = smov [#allocation2]  }
  0x26   :  { %s90_s25 = sshll.u32 %s2632_s24, 4  ;;  %s26_s27 = sshll.u32 %s2633_s26, 4  ;;  %s91_s25 = int_to_ptr.vmem [resolvable:$true] %s90_s25  ;;  %s2740_s27 = int_to_ptr.vmem [resolvable:$true] %s26_s27 }
  0x27   :  { %s2486_s13 = scalar_lea.hbm %s3004_s7, 2048 }
  0x28   :  { %p2487_p2 = scmp.ne.s32.totalorder %s3004_s7, %s2486_s13  ;;  %p2490_p3 = scmp.lt.u32.totalorder %s2486_s13, %s3004_s7 }
  0x2a   :  { %p2492_p4 = pnand %p2490_p3, %p2487_p2 }
  0x2c   :  { %2495 = shalt.err (!%p2492_p4)
}
  0x2d   :  { %s2496_s3 = scalar_lea.vmem %s91_s25, 2048  ;;  %p2501_p6 = scmp.lt.s32.totalorder %s91_s25, %s91_s25 }
  0x2e   :  { %p2497_p5 = scmp.ne.s32.totalorder %s91_s25, %s2496_s3  ;;  %p2502_p7 = scmp.lt.s32.totalorder %s2496_s3, %s2496_s3 }
  0x30   :  { %p2503_p8 = por %p2502_p7, %p2501_p6 }
  0x32   :  { %p2504_p9 = pnand %p2503_p8, %p2497_p5 }
  0x34   :  { %2507 = shalt.err (!%p2504_p9)
}
  0x35   :  { %96 = dma.hbm_to_vmem [thread:$0]  %s3004_s7, 2048, %s91_s25, [#allocation12], %s2630_s29, %s2630_s29, %s2631_s30  }
  0x36   :  { %s2508_s23 = scalar_lea.hbm %s2997_s0, 256 }
  0x37   :  { %p2509_p10 = scmp.ne.s32.totalorder %s2997_s0, %s2508_s23  ;;  %p2512_p11 = scmp.lt.u32.totalorder %s2508_s23, %s2997_s0 }
  0x39   :  { %p2514_p12 = pnand %p2512_p11, %p2509_p10 }
  0x3b   :  { %2517 = shalt.err (!%p2514_p12)
}
  0x3c   :  { %s2518_s28 = scalar_lea.vmem %s2740_s27, 256  ;;  %p2523_p0 = scmp.lt.s32.totalorder %s2740_s27, %s2740_s27 }
  0x3d   :  { %p2519_p13 = scmp.ne.s32.totalorder %s2740_s27, %s2518_s28  ;;  %p2524_p1 = scmp.lt.s32.totalorder %s2518_s28, %s2518_s28 }
  0x3f   :  { %p2525_p2 = por %p2524_p1, %p2523_p0 }
  0x41   :  { %p2526_p3 = pnand %p2525_p2, %p2519_p13 }
  0x43   :  { %2529 = shalt.err (!%p2526_p3)
}
  0x44   :  { %32 = dma.hbm_to_vmem [thread:$0]  %s2997_s0, 256, %s2740_s27, [#allocation3], %s2630_s29, %s2630_s29, %s2631_s30  }
  0x45   :  { %s2634_s12 = smov [#allocation7]   ;;  %s2635_s14 = smov [#allocation10]  }
  0x46   :  { %s50_s13 = sshll.u32 %s2634_s12, 4  ;;  %s76_s15 = sshll.u32 %s2635_s14, 4  ;;  %s51_s13 = int_to_ptr.vmem [resolvable:$true] %s50_s13  ;;  %s2777_s15 = int_to_ptr.vmem [resolvable:$true] %s76_s15 }
  0x47   :  { %s2530_s3 = scalar_lea.hbm %s2999_s2, 256 }
  0x48   :  { %p2531_p4 = scmp.ne.s32.totalorder %s2999_s2, %s2530_s3  ;;  %p2534_p5 = scmp.lt.u32.totalorder %s2530_s3, %s2999_s2 }
  0x4a   :  { %p2536_p6 = pnand %p2534_p5, %p2531_p4 }
  0x4c   :  { %2539 = shalt.err (!%p2536_p6)
}
  0x4d   :  { %s2540_s0 = scalar_lea.vmem %s51_s13, 256  ;;  %p2545_p8 = scmp.lt.s32.totalorder %s51_s13, %s51_s13 }
  0x4e   :  { %p2541_p7 = scmp.ne.s32.totalorder %s51_s13, %s2540_s0  ;;  %p2546_p9 = scmp.lt.s32.totalorder %s2540_s0, %s2540_s0 }
  0x50   :  { %p2547_p10 = por %p2546_p9, %p2545_p8 }
  0x52   :  { %p2548_p11 = pnand %p2547_p10, %p2541_p7 }
  0x54   :  { %2551 = shalt.err (!%p2548_p11)
}
  0x55   :  { %56 = dma.hbm_to_vmem [thread:$0]  %s2999_s2, 256, %s51_s13, [#allocation6], %s2630_s29, %s2630_s29, %s2631_s30  }
  0x56   :  { %s2552_s24 = scalar_lea.hbm %s3002_s5, 2048 }
  0x57   :  { %p2553_p12 = scmp.ne.s32.totalorder %s3002_s5, %s2552_s24  ;;  %p2556_p13 = scmp.lt.u32.totalorder %s2552_s24, %s3002_s5 }
  0x59   :  { %p2558_p0 = pnand %p2556_p13, %p2553_p12 }
  0x5b   :  { %2561 = shalt.err (!%p2558_p0)
}
  0x5c   :  { %s2562_s12 = scalar_lea.vmem %s2777_s15, 2048  ;;  %p2567_p2 = scmp.lt.s32.totalorder %s2777_s15, %s2777_s15 }
  0x5d   :  { %p2563_p1 = scmp.ne.s32.totalorder %s2777_s15, %s2562_s12  ;;  %p2568_p3 = scmp.lt.s32.totalorder %s2562_s12, %s2562_s12 }
  0x5f   :  { %p2569_p4 = por %p2568_p3, %p2567_p2 }
  0x61   :  { %p2570_p5 = pnand %p2569_p4, %p2563_p1 }
  0x63   :  { %2573 = shalt.err (!%p2570_p5)
}
  0x64   :  { %82 = dma.hbm_to_vmem [thread:$0]  %s3002_s5, 2048, %s2777_s15, [#allocation9], %s2630_s29, %s2630_s29, %s2631_s30  }
  0x65   :  { %s2636_s14 = smov [#allocation13]   ;;  %s2574_s20 = scalar_lea.hbm %s3006_s9, 2048 }
  0x66   :  { %s104_s16 = sshll.u32 %s2636_s14, 4  ;;  %p2575_p6 = scmp.ne.s32.totalorder %s3006_s9, %s2574_s20  ;;  %s105_s16 = int_to_ptr.vmem [resolvable:$true] %s104_s16 }
  0x67   :  { %p2578_p7 = scmp.lt.u32.totalorder %s2574_s20, %s3006_s9 }
  0x69   :  { %p2580_p8 = pnand %p2578_p7, %p2575_p6 }
  0x6b   :  { %2583 = shalt.err (!%p2580_p8)
}
  0x6c   :  { %s2584_s27 = scalar_lea.vmem %s105_s16, 2048  ;;  %p2589_p10 = scmp.lt.s32.totalorder %s105_s16, %s105_s16 }
  0x6d   :  { %p2585_p9 = scmp.ne.s32.totalorder %s105_s16, %s2584_s27  ;;  %p2590_p11 = scmp.lt.s32.totalorder %s2584_s27, %s2584_s27 }
  0x6f   :  { %p2591_p12 = por %p2590_p11, %p2589_p10 }
  0x71   :  { %p2592_p13 = pnand %p2591_p12, %p2585_p9 }
  0x73   :  { %2595 = shalt.err (!%p2592_p13)
}
  0x74   :  { %110 = dma.hbm_to_vmem [thread:$0]  %s3006_s9, 2048, %s105_s16, [#allocation12], %s2630_s29, %s2630_s29, %s2631_s30  }
  0x75   :  { %2618 = dma.done.wait [#allocation3], 256  }
  0x76   :  { %2619 = vsyncadd [#allocation3], 4294967040 }
  0x77   :  { %2620 = dma.done.wait [#allocation6], 512  }
  0x78   :  { %2621 = vsyncadd [#allocation6], 4294966784 }
  0x79   :  { %2622 = dma.done.wait [#allocation9], 4096  }
  0x7a   :  { %2623 = vsyncadd [#allocation9], 4294963200 }
  0x7b   :  { %2624 = dma.done.wait [#allocation12], 4096  }
  0x7c   :  { %2625 = vsyncadd [#allocation12], 4294963200  ;;  %v236_v0 = vld [vmem:[#allocation10] sm:$0xff]  ;;  %v237_v1 = vld [vmem:[#allocation10 + $0x8] sm:$0xff]  ;;  %vm2638_vm0 = vmmov 0   ;;  %vm482_vm1 = vcmask 261120  }
  0x7d   :  { %v136_v2 = vld [vmem:[#allocation8] sm:$0xff]  ;;  %v2284_v3 = vpack.c.bf16 %v237_v1, %v236_v0  ;;  %v137_v4 = vld [vmem:[#allocation8 + $0x8] sm:$0xff]  ;;  %v238_v5 = vld [vmem:[#allocation10 + $0x10] sm:$0xff]  ;;  %s2639_s24 = smov 96   ;;  %vm1075_vm2 = vcmask 64512   ;;  %vm1774_vm3 = vcmask 523264  }
  0x7e   :  { %v239_v6 = vld [vmem:[#allocation10 + $0x18] sm:$0xff]  ;;  %v2252_v7 = vpack.c.bf16 %v137_v4, %v136_v2  ;;  %v138_v9 = vld [vmem:[#allocation8 + $0x10] sm:$0xff]  ;;  %v240_v11 = vld [vmem:[#allocation10 + $0x20] sm:$0xff]  ;;  %vm1777_vm4 = vcmask 785408   ;;  %s2642_s25 = smov [#allocation14]  }
  0x7f   :  { %v2288_v8 = vpack.c.bf16 %v239_v6, %v238_v5  ;;  %v139_v10 = vld [vmem:[#allocation8 + $0x18] sm:$0xff]  ;;  %2285 = vmatprep.subr.bf16.mxu1 %v2284_v3  ;;  %v241_v13 = vld [vmem:[#allocation10 + $0x28] sm:$0xff]  ;;  %v140_v14 = vld [vmem:[#allocation8 + $0x20] sm:$0xff]  ;;  %s1885_s12 = sshll.u32 %s2642_s25, 4  ;;  %s1886_s12 = int_to_ptr.vmem [resolvable:$true] %s1885_s12 }
  0x80   :  { %v2256_v12 = vpack.c.bf16 %v139_v10, %v138_v9  ;;  %v141_v15 = vld [vmem:[#allocation8 + $0x28] sm:$0xff]  ;;  %2287 = vmatpush3.bf16.msra.mxu1 %v2284_v3  ;;  %2253 = vmatprep.subr.bf16.mxu0 %v2252_v7  ;;  %v2292_v16 = vpack.c.bf16 %v241_v13, %v240_v11  ;;  %v242_v18 = vld [vmem:[#allocation10 + $0x30] sm:$0xff]  ;;  %v243_v19 = vld [vmem:[#allocation10 + $0x38] sm:$0xff]  ;;  %s2596_s2 = scalar_lea.vmem %s1886_s12, 256  ;;  %p2601_p1 = scmp.lt.s32.totalorder %s1886_s12, %s1886_s12 }
  0x81   :  { %2255 = vmatpush3.bf16.msra.mxu0 %v2252_v7  ;;  %2289 = vmatprep.subr.bf16.mxu1 %v2288_v8  ;;  %v2260_v17 = vpack.c.bf16 %v141_v15, %v140_v14  ;;  %v142_v20 = vld [vmem:[#allocation8 + $0x30] sm:$0xff]  ;;  %v143_v21 = vld [vmem:[#allocation8 + $0x38] sm:$0xff]  ;;  %v2296_v22 = vpack.c.bf16 %v243_v19, %v242_v18  ;;  %v244_v24 = vld [vmem:[#allocation10 + $0x40] sm:$0xff]  ;;  %v2637_v14 = vmov 0.0   ;;  %p2597_p0 = scmp.ne.s32.totalorder %s1886_s12, %s2596_s2  ;;  %p2602_p2 = scmp.lt.s32.totalorder %s2596_s2, %s2596_s2 }
  0x82   :  { %2257 = vmatprep.subr.bf16.mxu0 %v2256_v12  ;;  %v2264_v23 = vpack.c.bf16 %v143_v21, %v142_v20  ;;  %v245_v25 = vld [vmem:[#allocation10 + $0x48] sm:$0xff]  ;;  %v234_v26 = vld [vmem:[#allocation5] sm:$0xff]  ;;  %v134_v29 = vld [vmem:[#allocation2] sm:$0xff] }
  0x83   :  { %v144_v27 = vld [vmem:[#allocation8 + $0x40] sm:$0xff]  ;;  %v145_v28 = vld [vmem:[#allocation8 + $0x48] sm:$0xff]  ;;  %2099 = vmatprep.mubr.f32.mxu1 %v234_v26  ;;  %2064 = vmatprep.mubr.f32.mxu0 %v134_v29  ;;  %v2300_v30 = vpack.c.bf16 %v245_v25, %v244_v24  ;;  %v246_v32 = vld [vmem:[#allocation10 + $0x50] sm:$0xff]  ;;  %p2603_p3 = por %p2602_p2, %p2601_p1 }
  0x84   :  { %2291 = vmatpush3.bf16.msra.mxu1 %v2288_v8  ;;  %v2268_v31 = vpack.c.bf16 %v145_v28, %v144_v27  ;;  %v247_v33 = vld [vmem:[#allocation10 + $0x58] sm:$0xff]  ;;  %v146_v34 = vld [vmem:[#allocation8 + $0x50] sm:$0xff]  ;;  %v248_v38 = vld [vmem:[#allocation10 + $0x60] sm:$0xff] }
  0x85   :  { %2259 = vmatpush3.bf16.msra.mxu0 %v2256_v12  ;;  %2293 = vmatprep.subr.bf16.mxu1 %v2292_v16  ;;  %v147_v35 = vld [vmem:[#allocation8 + $0x58] sm:$0xff]  ;;  %v2304_v36 = vpack.c.bf16 %v247_v33, %v246_v32  ;;  %v249_v39 = vld [vmem:[#allocation10 + $0x68] sm:$0xff]  ;;  %v148_v40 = vld [vmem:[#allocation8 + $0x60] sm:$0xff]  ;;  %p2604_p4 = pnand %p2603_p3, %p2597_p0 }
  0x86   :  { %2261 = vmatprep.subr.bf16.mxu0 %v2260_v17  ;;  %v2272_v37 = vpack.c.bf16 %v147_v35, %v146_v34  ;;  %v149_v41 = vld [vmem:[#allocation8 + $0x68] sm:$0xff]  ;;  %v2308_v42 = vpack.c.bf16 %v249_v39, %v248_v38  ;;  %v250_v44 = vld [vmem:[#allocation10 + $0x70] sm:$0xff]  ;;  %v251_v45 = vld [vmem:[#allocation10 + $0x78] sm:$0xff] }
  0x87   :  { %v2276_v43 = vpack.c.bf16 %v149_v41, %v148_v40  ;;  %v150_v46 = vld [vmem:[#allocation8 + $0x70] sm:$0xff]  ;;  %v151_v47 = vld [vmem:[#allocation8 + $0x78] sm:$0xff]  ;;  %v2312_v48 = vpack.c.bf16 %v251_v45, %v250_v44  ;;  %v336_v50 = vld [vmem:[#allocation11] sm:$0xff] }
  0x88   :  { %2295 = vmatpush3.bf16.msra.mxu1 %v2292_v16  ;;  %v2280_v49 = vpack.c.bf16 %v151_v47, %v150_v46  ;;  %v337_v51 = vld [vmem:[#allocation11 + $0x8] sm:$0xff]  ;;  %v338_v53 = vld [vmem:[#allocation11 + $0x10] sm:$0xff]  ;;  %v339_v54 = vld [vmem:[#allocation11 + $0x18] sm:$0xff] }
  0x89   :  { %2263 = vmatpush3.bf16.msra.mxu0 %v2260_v17  ;;  %2297 = vmatprep.subr.bf16.mxu1 %v2296_v22  ;;  %v2316_v52 = vpack.c.bf16 %v337_v51, %v336_v50  ;;  %v235_v55 = vld [vmem:[#allocation5 + $0x8] sm:$0xff]  ;;  %v135_v56 = vld [vmem:[#allocation2 + $0x8] sm:$0xff]  ;;  %v2320_v57 = vpack.c.bf16 %v339_v54, %v338_v53  ;;  %v334_v58 = vld [vmem:[#allocation7] sm:$0xff] }
  0x8a   :  { %2265 = vmatprep.subr.bf16.mxu0 %v2264_v23  ;;  %v340_v59 = vld [vmem:[#allocation11 + $0x20] sm:$0xff]  ;;  %v341_v60 = vld [vmem:[#allocation11 + $0x28] sm:$0xff]  ;;  %v342_v62 = vld [vmem:[#allocation11 + $0x30] sm:$0xff] }
  0x8b   :  { %v2324_v61 = vpack.c.bf16 %v341_v60, %v340_v59  ;;  %v343_v63 = vld [vmem:[#allocation11 + $0x38] sm:$0xff]  ;;  %v344_v1 = vld [vmem:[#allocation11 + $0x40] sm:$0xff]  ;;  %v345_v2 = vld [vmem:[#allocation11 + $0x48] sm:$0xff] }
  0x8c   :  { %2299 = vmatpush3.bf16.msra.mxu1 %v2296_v22  ;;  %v2328_v0 = vpack.c.bf16 %v343_v63, %v342_v62  ;;  %v2332_v3 = vpack.c.bf16 %v345_v2, %v344_v1  ;;  %v346_v4 = vld [vmem:[#allocation11 + $0x50] sm:$0xff]  ;;  %v347_v5 = vld [vmem:[#allocation11 + $0x58] sm:$0xff]  ;;  %v348_v7 = vld [vmem:[#allocation11 + $0x60] sm:$0xff] }
  0x8d   :  { %2267 = vmatpush3.bf16.msra.mxu0 %v2264_v23  ;;  %2301 = vmatprep.subr.bf16.mxu1 %v2300_v30  ;;  %v2336_v6 = vpack.c.bf16 %v347_v5, %v346_v4  ;;  %v349_v8 = vld [vmem:[#allocation11 + $0x68] sm:$0xff]  ;;  %v350_v10 = vld [vmem:[#allocation11 + $0x70] sm:$0xff]  ;;  %v351_v11 = vld [vmem:[#allocation11 + $0x78] sm:$0xff] }
  0x8e   :  { %2269 = vmatprep.subr.bf16.mxu0 %v2268_v31  ;;  %v2340_v9 = vpack.c.bf16 %v349_v8, %v348_v7  ;;  %v2344_v12 = vpack.c.bf16 %v351_v11, %v350_v10  ;;  %v335_v13 = vld [vmem:[#allocation7 + $0x8] sm:$0xff]  ;;  %v1901_v15 = vld [vmem:[%s3003_s6] ss:$0 sm:$0xff]  ;;  %s2641_s6 = smov 32  }
  0x8f   :  { %v1900_v17 = vld [vmem:[%s3001_s4] ss:$0 sm:$0xff]  ;;  %s2640_s4 = smov 64  }
  0x90   :  { %2303 = vmatpush3.bf16.msra.mxu1 %v2300_v30  ;;  %v1902_v25 = vld [vmem:[%s3005_s8] ss:$0 sm:$0xff] }
  0x91   :  { %2271 = vmatpush3.bf16.msra.mxu0 %v2268_v31  ;;  %2305 = vmatprep.subr.bf16.mxu1 %v2304_v36 }
  0x92   :  { %2273 = vmatprep.subr.bf16.mxu0 %v2272_v37 }
  0x94   :  { %2307 = vmatpush3.bf16.msra.mxu1 %v2304_v36 }
  0x95   :  { %2275 = vmatpush3.bf16.msra.mxu0 %v2272_v37  ;;  %2309 = vmatprep.subr.bf16.mxu1 %v2308_v42 }
  0x96   :  { %2277 = vmatprep.subr.bf16.mxu0 %v2276_v43 }
  0x98   :  { %2311 = vmatpush3.bf16.msra.mxu1 %v2308_v42 }
  0x99   :  { %2279 = vmatpush3.bf16.msra.mxu0 %v2276_v43  ;;  %2313 = vmatprep.subr.bf16.mxu1 %v2312_v48 }
  0x9a   :  { %2281 = vmatprep.subr.bf16.mxu0 %v2280_v49 }
  0x9c   :  { %2315 = vmatpush3.bf16.msra.mxu1 %v2312_v48 }
  0x9d   :  { %2283 = vmatpush3.bf16.msra.mxu0 %v2280_v49  ;;  %2137 = vmatprep.subr.mxu1 %v2637_v14 }
  0x9e   :  { %2317 = vmatprep.subr.bf16.mxu0 %v2316_v52 }
  0x9f   :  { %2100 = vmatmul.mubr.f32.vlgmr.msra.gmra.mrb[0].mxu1 %v235_v55 }
  0xa0   :  { %2065 = vmatmul.mubr.f32.vlgmr.msra.gmra.mrb[0].mxu0 %v135_v56  ;;  %2139 = vmatprep.mubr.msk.f32.mxu1 %vm2638_vm0, %v2637_v14 }
  0xa1   :  { %2319 = vmatpush3.bf16.msra.mxu0 %v2316_v52  ;;  %2134 = vmatprep.mubr.f32.mxu0 %v334_v58 }
  0xa2   :  { %2321 = vmatprep.subr.bf16.mxu0 %v2320_v57 }
  0xa5   :  { %2323 = vmatpush3.bf16.msra.mxu0 %v2320_v57 }
  0xa6   :  { %2325 = vmatprep.subr.bf16.mxu0 %v2324_v61 }
  0xa9   :  { %2327 = vmatpush3.bf16.msra.mxu0 %v2324_v61 }
  0xaa   :  { %2329 = vmatprep.subr.bf16.mxu0 %v2328_v0 }
  0xad   :  { %2331 = vmatpush3.bf16.msra.mxu0 %v2328_v0 }
  0xae   :  { %2333 = vmatprep.subr.bf16.mxu0 %v2332_v3 }
  0xb1   :  { %2335 = vmatpush3.bf16.msra.mxu0 %v2332_v3 }
  0xb2   :  { %2337 = vmatprep.subr.bf16.mxu0 %v2336_v6 }
  0xb5   :  { %2339 = vmatpush3.bf16.msra.mxu0 %v2336_v6 }
  0xb6   :  { %2341 = vmatprep.subr.bf16.mxu0 %v2340_v9 }
  0xb9   :  { %2343 = vmatpush3.bf16.msra.mxu0 %v2340_v9 }
  0xba   :  { %2345 = vmatprep.subr.bf16.mxu0 %v2344_v12 }
  0xbd   :  { %2347 = vmatpush3.bf16.msra.mxu0 %v2344_v12 }
  0xc0   :  { %2135 = vmatmul.mubr.f32.vlgmr.msra.gmra.mrb[2].mxu0 %v335_v13 }
 0x172   :  { %v2101_v16 = vpop.f32.mrb[0].mxu1 }
 0x173   :  { %v331_v18 = vadd.f32 %v2101_v16, %v1901_v15  ;;  %v325_v19 = vpop.f32.mrb[1].mxu1  ;;  %v2066_v20 = vpop.f32.mrb[0].mxu0 }
 0x174   :  { %v326_v21 = vadd.f32 %v1901_v15, %v325_v19  ;;  %v225_v22 = vpop.f32.mrb[1].mxu0  ;;  %v231_v23 = vadd.f32 %v2066_v20, %v1900_v17 }
 0x175   :  { %452 = vrot.lane.b32.xlu1 %v331_v18, %s2639_s24  ;;  %v226_v24 = vadd.f32 %v1900_v17, %v225_v22 }
 0x176   :  { %450 = vrot.lane.b32.xlu0 %v326_v21, %s2639_s24  ;;  %2138 = vmatpush3.xpose.msk.msra.mxu1 %vm482_vm1, %v326_v21 }
 0x177   :  { %2142 = vmatprep.subr.mxu1 %v2637_v14 }
 0x179   :  { %438 = vrot.lane.b32.xlu1 %v231_v23, %s2639_s24  ;;  %2140 = vmatmul.mubr.msk.f32.vlgmr.msra.gmra.mrb[2].mxu1 %vm482_vm1, %v226_v24 }
 0x17a   :  { %436 = vrot.lane.b32.xlu0 %v226_v24, %s2639_s24  ;;  %2143 = vmatpush3.xpose.msk.msra.mxu1 %vm482_vm1, %v331_v18 }
 0x17b   :  { %2144 = vmatprep.mubr.msk.f32.mxu1 %vm2638_vm0, %v2637_v14  ;;  %2147 = vmatprep.subr.mxu1 %v2637_v14 }
 0x17d   :  { %440 = vrot.lane.b32.xlu1 %v226_v24, %s2640_s4  ;;  %2145 = vmatmul.mubr.msk.f32.vlgmr.msra.gmra.mrb[4].mxu1 %vm482_vm1, %v231_v23 }
 0x17e   :  { %454 = vrot.lane.b32.xlu0 %v326_v21, %s2640_s4  ;;  %2149 = vmatprep.mubr.msk.f32.mxu1 %vm2638_vm0, %v2637_v14 }
 0x181   :  { %442 = vrot.lane.b32.xlu1 %v231_v23, %s2640_s4 }
 0x182   :  { %456 = vrot.lane.b32.xlu0 %v331_v18, %s2640_s4 }
 0x185   :  { %444 = vrot.lane.b32.xlu1 %v226_v24, %s2641_s6 }
 0x186   :  { %458 = vrot.lane.b32.xlu0 %v326_v21, %s2641_s6 }
 0x189   :  { %446 = vrot.lane.b32.xlu1 %v231_v23, %s2641_s6 }
 0x18a   :  { %460 = vrot.lane.b32.xlu0 %v331_v18, %s2641_s6 }
 0x193   :  { %v2136_v26 = vpop.f32.mrb[2].mxu0 }
 0x194   :  { %v2863_v27 = vadd.f32 %v2136_v26, %v1902_v25  ;;  %v425_v28 = vpop.f32.mrb[3].mxu0 }
 0x195   :  { %v2865_v29 = vadd.f32 %v1902_v25, %v425_v28 }
 0x197   :  { %464 = vrot.lane.b32.xlu1 %v2865_v29, %s2639_s24 }
 0x1e7   :  { %v453_v30 = vpop.permute.xlu1 %452 }
 0x1e8   :  { %v451_v31 = vpop.permute.xlu0 %450 }
 0x1e9   :  { %2148 = vmatpush3.xpose.msk.msra.mxu1 %vm482_vm1, %v451_v31 }
 0x1ea   :  { %2152 = vmatprep.subr.mxu1 %v2637_v14 }
 0x1eb   :  { %v439_v32 = vpop.permute.xlu1 %438 }
 0x1ec   :  { %v437_v33 = vpop.permute.xlu0 %436 }
 0x1ed   :  { %2150 = vmatmul.mubr.msk.f32.vlgmr.msra.gmra.mrb[6].mxu1 %vm482_vm1, %v437_v33 }
 0x1ee   :  { %2153 = vmatpush3.xpose.msk.msra.mxu1 %vm482_vm1, %v453_v30  ;;  %2154 = vmatprep.mubr.msk.f32.mxu1 %vm2638_vm0, %v2637_v14 }
 0x1ef   :  { %v441_v34 = vpop.permute.xlu1 %440  ;;  %2157 = vmatprep.subr.mxu1 %v2637_v14 }
 0x1f0   :  { %v455_v35 = vpop.permute.xlu0 %454 }
 0x1f1   :  { %2155 = vmatmul.mubr.msk.f32.vlgmr.msra.gmra.mrb[8].mxu1 %vm482_vm1, %v439_v32 }
 0x1f2   :  { %2158 = vmatpush3.xpose.msk.msra.mxu1 %vm482_vm1, %v455_v35  ;;  %2159 = vmatprep.mubr.msk.f32.mxu1 %vm2638_vm0, %v2637_v14 }
 0x1f3   :  { %2162 = vmatprep.subr.mxu1 %v2637_v14  ;;  %v443_v36 = vpop.permute.xlu1 %442 }
 0x1f4   :  { %v457_v37 = vpop.permute.xlu0 %456 }
 0x1f5   :  { %2160 = vmatmul.mubr.msk.f32.vlgmr.msra.gmra.mrb[10].mxu1 %vm482_vm1, %v441_v34 }
 0x1f6   :  { %2163 = vmatpush3.xpose.msk.msra.mxu1 %vm482_vm1, %v457_v37  ;;  %2164 = vmatprep.mubr.msk.f32.mxu1 %vm2638_vm0, %v2637_v14 }
 0x1f7   :  { %2167 = vmatprep.subr.mxu1 %v2637_v14  ;;  %v445_v39 = vpop.permute.xlu1 %444 }
 0x1f8   :  { %v459_v38 = vpop.permute.xlu0 %458 }
 0x1f9   :  { %2165 = vmatmul.mubr.msk.f32.vlgmr.msra.gmra.mrb[12].mxu1 %vm482_vm1, %v443_v36 }
 0x1fa   :  { %2168 = vmatpush3.xpose.msk.msra.mxu1 %vm482_vm1, %v459_v38  ;;  %2169 = vmatprep.mubr.msk.f32.mxu1 %vm2638_vm0, %v2637_v14 }
 0x1fb   :  { %2172 = vmatprep.subr.mxu1 %v2637_v14  ;;  %v447_v41 = vpop.permute.xlu1 %446 }
 0x1fc   :  { %v461_v40 = vpop.permute.xlu0 %460 }
 0x1fd   :  { %2170 = vmatmul.mubr.msk.f32.vlgmr.msra.gmra.mrb[14].mxu1 %vm482_vm1, %v445_v39 }
 0x1fe   :  { %2173 = vmatpush3.xpose.msk.msra.mxu1 %vm482_vm1, %v461_v40  ;;  %2174 = vmatprep.mubr.msk.f32.mxu1 %vm2638_vm0, %v2637_v14 }
 0x1ff   :  { %2177 = vmatprep.subr.mxu1 %v2637_v14 }
 0x201   :  { %2175 = vmatmul.mubr.msk.f32.vlgmr.msra.gmra.mrb[16].mxu1 %vm482_vm1, %v447_v41 }
 0x202   :  { %2178 = vmatpush3.msra.mxu1 %v2865_v29  ;;  %2179 = vmatprep.mubr.msk.f32.mxu1 %vm2638_vm0, %v2637_v14 }
 0x203   :  { %2182 = vmatprep.subr.mxu1 %v2637_v14 }
 0x209   :  { %v465_v0 = vpop.permute.xlu1 %464 }
 0x24c   :  { %v553_v42 = vpop.f32.mrb[2].mxu1 }
 0x24d   :  { %v2141_v43 = vpop.f32.mrb[3].mxu1  ;;  %v1076_v44 = vsel %vm1075_vm2, %v553_v42, -inf }
 0x24e   :  { %1077 = vmax.xlane.f32.xlu0 %v1076_v44 }
 0x250   :  { %v627_v45 = vpop.f32.mrb[4].mxu1 }
 0x251   :  { %v2146_v46 = vpop.f32.mrb[5].mxu1  ;;  %v1079_v47 = vsel %vm1075_vm2, %v627_v45, -inf }
 0x252   :  { %1080 = vmax.xlane.f32.xlu1 %v1079_v47 }
 0x263   :  { %470 = vrot.lane.b32.xlu1 %v2865_v29, %s2640_s4 }
 0x267   :  { %472 = vrot.lane.b32.xlu1 %v2863_v27, %s2640_s4 }
 0x2c0   :  { %v701_v48 = vpop.f32.mrb[6].mxu1 }
 0x2c1   :  { %v2151_v49 = vpop.f32.mrb[7].mxu1  ;;  %v1082_v50 = vsel %vm1075_vm2, %v701_v48, -inf }
 0x2c2   :  { %1083 = vmax.xlane.f32.xlu0 %v1082_v50 }
 0x2c4   :  { %v775_v51 = vpop.f32.mrb[8].mxu1 }
 0x2c5   :  { %v2156_v52 = vpop.f32.mrb[9].mxu1  ;;  %v1085_v53 = vsel %vm1075_vm2, %v775_v51, -inf }
 0x2c6   :  { %1086 = vmax.xlane.f32.xlu0 %v1085_v53 }
 0x2c8   :  { %v849_v54 = vpop.f32.mrb[10].mxu1 }
 0x2c9   :  { %v2161_v55 = vpop.f32.mrb[11].mxu1  ;;  %v1088_v56 = vsel %vm1075_vm2, %v849_v54, -inf }
 0x2ca   :  { %1089 = vmax.xlane.f32.xlu1 %v1088_v56  ;;  %v1780_v55 = vld [vmem:[#allocation13] sm:$0xff]  ;;  %v1781_v56 = vld [vmem:[#allocation13 + $0x8] sm:$0xff] }
 0x2cc   :  { %v2910_v57 = vpop.f32.mrb[12].mxu1 }
 0x2cd   :  { %v2166_v58 = vpop.f32.mrb[13].mxu1  ;;  %v1091_v9 = vsel %vm1075_vm2, %v2910_v57, -inf }
 0x2ce   :  { %v1783_v58 = vld [vmem:[#allocation13 + $0x18] sm:$0xff] }
 0x2d0   :  { %v997_v59 = vpop.f32.mrb[14].mxu1 }
 0x2d1   :  { %v2171_v60 = vpop.f32.mrb[15].mxu1  ;;  %v1094_v61 = vsel %vm1075_vm2, %v997_v59, -inf }
 0x2d2   :  { %1095 = vmax.xlane.f32.xlu1 %v1094_v61  ;;  %v1784_v61 = vld [vmem:[#allocation13 + $0x20] sm:$0xff] }
 0x2d4   :  { %v2913_v62 = vpop.f32.mrb[16].mxu1 }
 0x2d5   :  { %v2176_v63 = vpop.f32.mrb[17].mxu1  ;;  %v1097_v10 = vsel %vm1075_vm2, %v2913_v62, -inf }
 0x2db   :  { %v1078_v1 = vpop.xlane.xlu0 %1077 }
 0x2dc   :  { %v1100_v2 = vsub.f32 %v553_v42, %v1078_v1  ;;  %466 = vrot.lane.b32.xlu0 %v2863_v27, %s2639_s24 }
 0x2de   :  { %v1108_v3 = vmul.f32 1.442695, %v1100_v2 }
 0x2df   :  { %v1081_v4 = vpop.xlane.xlu1 %1080 }
 0x2e0   :  { %2410 = vpow2.f32 %v1108_v3  ;;  %v1101_v5 = vsub.f32 %v627_v45, %v1081_v4  ;;  %v1786_v4 = vld [vmem:[#allocation13 + $0x30] sm:$0xff] }
 0x2e2   :  { %v1110_v6 = vmul.f32 1.442695, %v1101_v5  ;;  %v1787_v5 = vld [vmem:[#allocation13 + $0x38] sm:$0xff] }
 0x2e3   :  { %478 = vrot.lane.b32.xlu1 %v2863_v27, %s2641_s6  ;;  %v471_v11 = vpop.permute.xlu1 %470 }
 0x2e4   :  { %2412 = vpow2.f32 %v1110_v6 }
 0x2e7   :  { %v473_v16 = vpop.permute.xlu1 %472 }
 0x2ea   :  { %v2411_v7 = vpop.eup %2410 }
 0x2eb   :  { %2180 = vmatmul.mubr.msk.f32.vlgmr.msra.gmra.mrb[18].mxu1 %vm1075_vm2, %v2411_v7  ;;  %v1124_v35 = vsel %vm1075_vm2, %v2411_v7, 0.0 }
 0x2ec   :  { %2183 = vmatpush3.msra.mxu1 %v2863_v27  ;;  %2184 = vmatprep.mubr.msk.f32.mxu1 %vm2638_vm0, %v2637_v14 }
 0x2ed   :  { %2187 = vmatprep.subr.mxu1 %v2637_v14 }
 0x2ee   :  { %v2924_v8 = vpop.eup %2412 }
 0x2ef   :  { %2185 = vmatmul.mubr.msk.f32.vlgmr.msra.gmra.mrb[20].mxu1 %vm1075_vm2, %v2924_v8 }
 0x2f0   :  { %2188 = vmatpush3.msra.mxu1 %v465_v0  ;;  %2189 = vmatprep.mubr.msk.f32.mxu1 %vm2638_vm0, %v2637_v14 }
 0x2f1   :  { %2192 = vmatprep.subr.mxu1 %v2637_v14 }
 0x2fb   :  { %1092 = vmax.xlane.f32.xlu0 %v1091_v9 }
 0x2ff   :  { %1098 = vmax.xlane.f32.xlu0 %v1097_v10  ;;  %v2360_v10 = vpack.c.bf16 %v1787_v5, %v1786_v4 }
 0x315   :  { %476 = vrot.lane.b32.xlu0 %v2865_v29, %s2641_s6 }
 0x34f   :  { %v1084_v12 = vpop.xlane.xlu0 %1083 }
 0x350   :  { %v1102_v13 = vsub.f32 %v701_v48, %v1084_v12  ;;  %v1127_v48 = vsel %vm1075_vm2, %v2924_v8, 0.0  ;;  %v1788_v12 = vld [vmem:[#allocation13 + $0x40] sm:$0xff] }
 0x352   :  { %v1112_v15 = vmul.f32 1.442695, %v1102_v13  ;;  %v1789_v13 = vld [vmem:[#allocation13 + $0x48] sm:$0xff] }
 0x353   :  { %v1087_v17 = vpop.xlane.xlu0 %1086 }
 0x354   :  { %2414 = vpow2.f32 %v1112_v15  ;;  %v1103_v18 = vsub.f32 %v775_v51, %v1087_v17 }
 0x356   :  { %v1114_v19 = vmul.f32 1.442695, %v1103_v18 }
 0x357   :  { %v1090_v20 = vpop.xlane.xlu1 %1089  ;;  %v467_v24 = vpop.permute.xlu0 %466 }
 0x358   :  { %2416 = vpow2.f32 %v1114_v19  ;;  %v1104_v21 = vsub.f32 %v849_v54, %v1090_v20  ;;  %v1790_v19 = vld [vmem:[#allocation13 + $0x50] sm:$0xff]  ;;  %v1791_v20 = vld [vmem:[#allocation13 + $0x58] sm:$0xff] }
 0x35a   :  { %v1116_v22 = vmul.f32 1.442695, %v1104_v21  ;;  %v2368_v21 = vpack.c.bf16 %v1791_v20, %v1790_v19 }
 0x35c   :  { %2418 = vpow2.f32 %v1116_v22 }
 0x35e   :  { %v2415_v23 = vpop.eup %2414 }
 0x35f   :  { %2190 = vmatmul.mubr.msk.f32.vlgmr.msra.gmra.mrb[22].mxu1 %vm1075_vm2, %v2415_v23  ;;  %v1096_v25 = vpop.xlane.xlu1 %1095  ;;  %v1130_v26 = vsel %vm1075_vm2, %v2415_v23, 0.0  ;;  %v1792_v23 = vld [vmem:[#allocation13 + $0x60] sm:$0xff] }
 0x360   :  { %2193 = vmatpush3.msra.mxu1 %v467_v24  ;;  %v1106_v27 = vsub.f32 %v997_v59, %v1096_v25  ;;  %1131 = vadd.xlane.f32.xlu0 %v1130_v26  ;;  %v1793_v24 = vld [vmem:[#allocation13 + $0x68] sm:$0xff] }
 0x361   :  { %2194 = vmatprep.mubr.msk.f32.mxu1 %vm2638_vm0, %v2637_v14  ;;  %2197 = vmatprep.subr.mxu1 %v2637_v14  ;;  %v2372_v26 = vpack.c.bf16 %v1793_v24, %v1792_v23 }
 0x362   :  { %v2417_v28 = vpop.eup %2416  ;;  %v1120_v29 = vmul.f32 1.442695, %v1106_v27  ;;  %v1794_v27 = vld [vmem:[#allocation13 + $0x70] sm:$0xff] }
 0x363   :  { %2195 = vmatmul.mubr.msk.f32.vlgmr.msra.gmra.mrb[24].mxu1 %vm1075_vm2, %v2417_v28  ;;  %v1133_v30 = vsel %vm1075_vm2, %v2417_v28, 0.0  ;;  %v479_v46 = vpop.permute.xlu1 %478  ;;  %v1795_v28 = vld [vmem:[#allocation13 + $0x78] sm:$0xff] }
 0x364   :  { %2420 = vpow2.f32 %v1120_v29  ;;  %2198 = vmatpush3.msra.mxu1 %v471_v11  ;;  %1134 = vadd.xlane.f32.xlu1 %v1133_v30  ;;  %v2376_v30 = vpack.c.bf16 %v1795_v28, %v1794_v27 }
 0x365   :  { %2199 = vmatprep.mubr.msk.f32.mxu1 %vm2638_vm0, %v2637_v14  ;;  %2202 = vmatprep.subr.mxu1 %v2637_v14 }
 0x366   :  { %v2419_v31 = vpop.eup %2418 }
 0x367   :  { %2200 = vmatmul.mubr.msk.f32.vlgmr.msra.gmra.mrb[26].mxu1 %vm1075_vm2, %v2419_v31  ;;  %v1136_v32 = vsel %vm1075_vm2, %v2419_v31, 0.0 }
 0x368   :  { %2203 = vmatpush3.msra.mxu1 %v473_v16  ;;  %1137 = vadd.xlane.f32.xlu0 %v1136_v32  ;;  %v2364_v16 = vpack.c.bf16 %v1789_v13, %v1788_v12 }
 0x369   :  { %2204 = vmatprep.mubr.msk.f32.mxu1 %vm2638_vm0, %v2637_v14  ;;  %2207 = vmatprep.subr.mxu1 %v2637_v14 }
 0x36e   :  { %v2421_v33 = vpop.eup %2420 }
 0x36f   :  { %v1142_v34 = vsel %vm1075_vm2, %v2421_v33, 0.0 }
 0x370   :  { %1143 = vadd.xlane.f32.xlu1 %v1142_v34 }
 0x374   :  { %1125 = vadd.xlane.f32.xlu1 %v1124_v35 }
 0x388   :  { %v1093_v36 = vpop.xlane.xlu0 %1092 }
 0x389   :  { %v1105_v37 = vsub.f32 %v2910_v57, %v1093_v36  ;;  %v1782_v57 = vld [vmem:[#allocation13 + $0x10] sm:$0xff] }
 0x38a   :  { %v2352_v60 = vpack.c.bf16 %v1783_v58, %v1782_v57 }
 0x38b   :  { %v1118_v38 = vmul.f32 1.442695, %v1105_v37 }
 0x38c   :  { %v1099_v39 = vpop.xlane.xlu0 %1098 }
 0x38d   :  { %2422 = vpow2.f32 %v1118_v38  ;;  %v1107_v40 = vsub.f32 %v2913_v62, %v1099_v39  ;;  %v1785_v62 = vld [vmem:[#allocation13 + $0x28] sm:$0xff] }
 0x38e   :  { %v2356_v1 = vpack.c.bf16 %v1785_v62, %v1784_v61 }
 0x38f   :  { %v1122_v41 = vmul.f32 1.442695, %v1107_v40 }
 0x390   :  { %v477_v43 = vpop.permute.xlu0 %476 }
 0x391   :  { %2424 = vpow2.f32 %v1122_v41 }
 0x397   :  { %v2423_v42 = vpop.eup %2422 }
 0x398   :  { %2205 = vmatmul.mubr.msk.f32.vlgmr.msra.gmra.mrb[28].mxu1 %vm1075_vm2, %v2423_v42  ;;  %v1139_v44 = vsel %vm1075_vm2, %v2423_v42, 0.0 }
 0x399   :  { %2208 = vmatpush3.msra.mxu1 %v477_v43  ;;  %1140 = vadd.xlane.f32.xlu0 %v1139_v44 }
 0x39a   :  { %2209 = vmatprep.mubr.msk.f32.mxu1 %vm2638_vm0, %v2637_v14  ;;  %2212 = vmatprep.subr.mxu1 %v2637_v14 }
 0x39b   :  { %v2425_v45 = vpop.eup %2424 }
 0x39c   :  { %2210 = vmatmul.mubr.msk.f32.vlgmr.msra.gmra.mrb[30].mxu1 %vm1075_vm2, %v2421_v33  ;;  %v1145_v47 = vsel %vm1075_vm2, %v2425_v45, 0.0 }
 0x39d   :  { %2213 = vmatpush3.msra.mxu1 %v479_v46  ;;  %1146 = vadd.xlane.f32.xlu0 %v1145_v47 }
 0x39e   :  { %2214 = vmatprep.mubr.msk.f32.mxu1 %vm2638_vm0, %v2637_v14  ;;  %v2348_v14 = vpack.c.bf16 %v1781_v56, %v1780_v55 }
 0x3a0   :  { %2215 = vmatmul.mubr.msk.f32.vlgmr.msra.gmra.mrb[32].mxu1 %vm1075_vm2, %v2425_v45  ;;  %2349 = vmatprep.subr.bf16.mxu0 %v2348_v14 }
 0x3a1   :  { %1128 = vadd.xlane.f32.xlu0 %v1127_v48  ;;  %2351 = vmatpush3.bf16.msra.mxu0 %v2348_v14 }
 0x3a2   :  { %2353 = vmatprep.subr.bf16.mxu0 %v2352_v60 }
 0x3a5   :  { %2355 = vmatpush3.bf16.msra.mxu0 %v2352_v60 }
 0x3a6   :  { %2357 = vmatprep.subr.bf16.mxu0 %v2356_v1 }
 0x3a9   :  { %2359 = vmatpush3.bf16.msra.mxu0 %v2356_v1 }
 0x3aa   :  { %2361 = vmatprep.subr.bf16.mxu0 %v2360_v10 }
 0x3ad   :  { %2363 = vmatpush3.bf16.msra.mxu0 %v2360_v10 }
 0x3ae   :  { %2365 = vmatprep.subr.bf16.mxu0 %v2364_v16 }
 0x3b1   :  { %2367 = vmatpush3.bf16.msra.mxu0 %v2364_v16 }
 0x3b2   :  { %2369 = vmatprep.subr.bf16.mxu0 %v2368_v21 }
 0x3b5   :  { %2371 = vmatpush3.bf16.msra.mxu0 %v2368_v21 }
 0x3b6   :  { %2373 = vmatprep.subr.bf16.mxu0 %v2372_v26 }
 0x3b9   :  { %2375 = vmatpush3.bf16.msra.mxu0 %v2372_v26 }
 0x3ba   :  { %2377 = vmatprep.subr.bf16.mxu0 %v2376_v30 }
 0x3bd   :  { %2379 = vmatpush3.bf16.msra.mxu0 %v2376_v30 }
 0x3be   :  { %v2968_v49 = vpop.f32.mrb[18].mxu1 }
 0x3bf   :  { %v2181_v50 = vpop.f32.mrb[19].mxu1 }
 0x3c2   :  { %v2970_v51 = vpop.f32.mrb[20].mxu1 }
 0x3c3   :  { %v2186_v52 = vpop.f32.mrb[21].mxu1 }
 0x3ed   :  { %v1132_v53 = vpop.xlane.xlu0 %1131 }
 0x3ee   :  { %2426 = vrcp.f32 %v1132_v53 }
 0x3f1   :  { %v1135_v54 = vpop.xlane.xlu1 %1134 }
 0x3f2   :  { %2428 = vrcp.f32 %v1135_v54 }
 0x3f5   :  { %v1138_v17 = vpop.xlane.xlu0 %1137 }
 0x3f6   :  { %2430 = vrcp.f32 %v1138_v17 }
 0x3f8   :  { %v2427_v0 = vpop.eup %2426 }
 0x3fc   :  { %v2429_v2 = vpop.eup %2428 }
 0x3fd   :  { %v1144_v22 = vpop.xlane.xlu1 %1143 }
 0x400   :  { %v2431_v29 = vpop.eup %2430 }
 0x401   :  { %v1126_v46 = vpop.xlane.xlu1 %1125 }
 0x426   :  { %v1141_v18 = vpop.xlane.xlu0 %1140 }
 0x427   :  { %2432 = vrcp.f32 %v1141_v18 }
 0x428   :  { %2434 = vrcp.f32 %v1144_v22 }
 0x42a   :  { %v1147_v25 = vpop.xlane.xlu0 %1146 }
 0x42b   :  { %2436 = vrcp.f32 %v1147_v25 }
 0x42c   :  { %2438 = vrcp.f32 %v1126_v46 }
 0x42e   :  { %v1129_v47 = vpop.xlane.xlu0 %1128 }
 0x42f   :  { %2440 = vrcp.f32 %v1129_v47 }
 0x431   :  { %v2433_v31 = vpop.eup %2432 }
 0x432   :  { %v1363_v59 = vpop.f32.mrb[22].mxu1  ;;  %v2435_v39 = vpop.eup %2434 }
 0x433   :  { %v2191_v63 = vpop.f32.mrb[23].mxu1  ;;  %v1742_v6 = vmul.f32 %v2427_v0, %v1363_v59 }
 0x435   :  { %v2437_v40 = vpop.eup %2436 }
 0x436   :  { %v1436_v3 = vpop.f32.mrb[24].mxu1  ;;  %v2439_v50 = vpop.eup %2438 }
 0x437   :  { %v1743_v7 = vmul.f32 %v2429_v2, %v1436_v3  ;;  %v2196_v8 = vpop.f32.mrb[25].mxu1  ;;  %v1740_v58 = vmul.f32 %v2439_v50, %v2968_v49 }
 0x439   :  { %v2395_v9 = vpack.i.bf16 %v1743_v7, %v1742_v6  ;;  %v2441_v53 = vpop.eup %2440 }
 0x43a   :  { %v1509_v11 = vpop.f32.mrb[26].mxu1  ;;  %v1741_v14 = vmul.f32 %v2441_v53, %v2970_v51  ;;  %v1927_v51 = vld [vmem:[%s3007_s10] ss:$0 sm:$0xff] }
 0x43b   :  { %2396 = vrot.lane.b32.xlu1 %v2395_v9, %s2641_s6  ;;  %v2201_v15 = vpop.f32.mrb[27].mxu1  ;;  %v1744_v33 = vmul.f32 %v2431_v29, %v1509_v11 }
 0x46b   :  { %v1582_v32 = vpop.f32.mrb[28].mxu1 }
 0x46c   :  { %v1745_v34 = vmul.f32 %v2433_v31, %v1582_v32  ;;  %v2206_v35 = vpop.f32.mrb[29].mxu1 }
 0x46e   :  { %v2400_v36 = vpack.i.bf16 %v1745_v34, %v1744_v33 }
 0x46f   :  { %v1655_v37 = vpop.f32.mrb[30].mxu1 }
 0x470   :  { %2401 = vrot.lane.b32.xlu0 %v2400_v36, %s2640_s4  ;;  %v2211_v38 = vpop.f32.mrb[31].mxu1  ;;  %v1746_v42 = vmul.f32 %v2435_v39, %v1655_v37 }
 0x473   :  { %v1728_v41 = vpop.f32.mrb[32].mxu1 }
 0x474   :  { %v1747_v43 = vmul.f32 %v2437_v40, %v1728_v41  ;;  %v2216_v44 = vpop.f32.mrb[33].mxu1 }
 0x476   :  { %v2405_v45 = vpack.i.bf16 %v1747_v43, %v1746_v42 }
 0x478   :  { %2406 = vrot.lane.b32.xlu1 %v2405_v45, %s2639_s24 }
 0x4ad   :  { %v2397_v48 = vpop.permute.xlu1 %2396 }
 0x4ae   :  { %v2399_v54 = vunpack.i.h.bf16 %v2397_v48  ;;  %v2398_v55 = vunpack.i.l.bf16 %v2397_v48 }
 0x4b0   :  { %v1773_v60 = vsel %vm482_vm1, %v1741_v14, %v2399_v54  ;;  %v1772_v63 = vsel %vm482_vm1, %v1740_v58, %v2398_v55 }
 0x4e2   :  { %v2402_v52 = vpop.permute.xlu0 %2401 }
 0x4e3   :  { %v2404_v56 = vunpack.i.h.bf16 %v2402_v52  ;;  %v2403_v57 = vunpack.i.l.bf16 %v2402_v52 }
 0x4e5   :  { %v1776_v0 = vsel %vm1774_vm3, %v1773_v60, %v2404_v56  ;;  %v1775_v1 = vsel %vm1774_vm3, %v1772_v63, %v2403_v57 }
 0x4ea   :  { %v2407_v59 = vpop.permute.xlu1 %2406 }
 0x4eb   :  { %v2409_v61 = vunpack.i.h.bf16 %v2407_v59  ;;  %v2408_v62 = vunpack.i.l.bf16 %v2407_v59 }
 0x4ed   :  { %v1778_v2 = vsel %vm1777_vm4, %v1775_v1, %v2408_v62  ;;  %v1779_v3 = vsel %vm1777_vm4, %v1776_v0, %v2409_v61 }
 0x4ee   :  { %2249 = vmatprep.mubr.f32.mxu0 %v1778_v2 }
 0x4ef   :  { %2250 = vmatmul.mubr.f32.vlgmr.msra.gmra.mrb[4].mxu0 %v1779_v3 }
 0x5c2   :  { %v2251_v49 = vpop.f32.mrb[4].mxu0 }
 0x5c3   :  { %v1875_v4 = vadd.f32 %v2251_v49, %v1927_v51  ;;  %v1869_v5 = vpop.f32.mrb[5].mxu0 }
 0x5c4   :  { %v1870_v6 = vadd.f32 %v1927_v51, %v1869_v5 }
 0x5c5   :  { %1879 = vst [vmem:[#allocation14 + $0x8] sm:$0xff] %v1875_v4 }
 0x5c6   :  { %1878 = vst [vmem:[#allocation14] sm:$0xff] %v1870_v6 }
 0x5c7   :  { %2607 = shalt.err (!%p2604_p4)
}
 0x5c8   :  { %s2608_s10 = scalar_lea.hbm %s3008_s11, 256 }
 0x5c9   :  { %p2609_p5 = scmp.ne.s32.totalorder %s3008_s11, %s2608_s10  ;;  %p2612_p6 = scmp.lt.u32.totalorder %s2608_s10, %s3008_s11 }
 0x5cb   :  { %p2614_p7 = pnand %p2612_p6, %p2609_p5 }
 0x5cd   :  { %2617 = shalt.err (!%p2614_p7)
}
 0x5ce   :  { %1891 = dma.vmem_to_hbm [thread:$0]  %s1886_s12, 256, %s3008_s11, [#allocation4], %s2630_s29, %s2630_s29, %s2631_s30  }
 0x5cf   :  { %2626 = dma.done.wait [#allocation4], 256  }
 0x5d0   :  { %2627 = vsyncadd [#allocation4], 4294967040 }
 0x5d1   :  { %1895 = vsyncpa [#allocation3], 1 }
 0x5d2   :  { %1896 = vsyncpa [#allocation6], 1 }
 0x5d3   :  { %1897 = vsyncpa [#allocation9], 1 }
 0x5d4   :  { %1898 = vsyncpa [#allocation12], 1 }
 0x5d5   :  { %1899 = vsyncpa [#allocation4], 1 }

</bundles_post_ra>
